<compile_context>
chip_gen: v5e
topology: v5e:2x2
jax: 0.10.0
libtpu: 0.0.40
codegen_flags: <defaults>
</compile_context>

<pallas_src>
from functools import partial

import jax
import jax.numpy as jnp
import numpy as np
from jax.experimental import pallas as pl
from jax.experimental.pallas import tpu as pltpu


def _round_up(x, m):
    return (x + m - 1) // m * m


def _device_kind():
    try:
        return jax.devices()[0].device_kind.lower()
    except Exception:
        return ""


# ---------------------------------------------------------------------------
# Pass 1: tiled im2col matmul (bf16 on MXU, f32 accumulation directly in y_ref)
#         + fused per-tile centered BN-statistics epilogue.
# ---------------------------------------------------------------------------
def conv_matmul_stats_kernel(a_ref, w_ref, y_ref, sum_ref, m2_ref, *,
                             tk, w_resident):
    k = pl.program_id(1)

    # y_ref is f32 and output-resident across the K (reduction) axis, so we
    # accumulate straight into it -- no VMEM scratch accumulator.
    @pl.when(k == 0)
    def _():
        y_ref[...] = jnp.zeros_like(y_ref)

    if w_resident:
        # Whole (K_p, Cout_p) weight block lives in VMEM (constant block index
        # => DMAed from HBM exactly once); slice the current K chunk out of it.
        w = w_ref[pl.ds(pl.multiple_of(k * tk, tk), tk), :]
    else:
        w = w_ref[...]

    y_ref[...] += jnp.dot(a_ref[...], w, preferred_element_type=jnp.float32)

    # NOTE: sum_ref / m2_ref are only written on the last K step.  This relies on
    # K being the innermost ("arbitrary") grid axis and on the stats blocks having
    # a constant block index in K (output residency across the reduction axis).
    @pl.when(k == pl.num_programs(1) - 1)
    def _():
        acc = y_ref[...]                              # (tm, Cout_p) f32
        tm = acc.shape[0]
        # Zero-padded rows (from M padding) contribute exactly 0 to the sum.
        s = jnp.sum(acc, axis=0, keepdims=True)       # (1, Cout_p)
        mu = s * (1.0 / tm)                           # tile mean over all tm rows
        d = acc - mu
        m2 = jnp.sum(d * d, axis=0, keepdims=True)    # centered 2nd moment
        sum_ref[...] = s[None]
        m2_ref[...] = m2[None]


# ---------------------------------------------------------------------------
# Pass 2: apply per-channel scale/shift (train-mode BN) + ReLU, lane-dense tiles.
# ---------------------------------------------------------------------------
def bn_apply_relu_kernel(y_ref, scale_ref, shift_ref, o_ref):
    o_ref[...] = jnp.maximum(y_ref[...] * scale_ref[...] + shift_ref[...], 0.0)


def basic_conv2d(x, weight, gamma, beta, *, stride, padding, eps=1e-3,
                 tm=1024, tk=512, out_layout="NCHW"):
    """x: (N, Cin, H, W) f32, weight: (Cout, Cin, KH, KW) f32 -> (N, Cout, OH, OW)."""
    N, Cin, H, W = x.shape
    Cout, _, KH, KW = weight.shape
    OH = (H + 2 * padding - KH) // stride + 1
    OW = (W + 2 * padding - KW) // stride + 1
    M = N * OH * OW
    K = Cin * KH * KW

    # Lane-dense output channels; on v6e/v7x (2x256^2 MXU) prefer 256-wide slabs
    # once Cout is past a single 128 slab.  v5e and older keep 128 alignment.
    kind = _device_kind()
    cout_align = 128
    if Cout > 128 and not any(v in kind for v in ("v2", "v3", "v4", "v5")):
        cout_align = 256
    Cout_p = _round_up(Cout, cout_align)

    # ---- tile planning ----------------------------------------------------
    tm = _round_up(min(tm, _round_up(M, 8)), 8)         # row tile (mult. of 8)
    tk = _round_up(min(tk, _round_up(K, 128)), 128)     # K tile  (mult. of 128)
    # v7x has two TensorCores sharing the "parallel" grid axes: make sure the M
    # axis has at least two tiles whenever there is enough work to split.
    if M >= 512:
        tm = min(tm, max(256, _round_up((M + 1) // 2, 8)))

    VMEM_BUDGET = 40 << 20  # conservative: fits v7x (64 MiB physical VMEM)

    def _plan(tm_, tk_):
        K_p_ = _round_up(K, tk_)
        w_resident_ = K_p_ * Cout_p * 2 <= (8 << 20)     # bf16 weight footprint
        w_b = 2 * (K_p_ if w_resident_ else tk_) * Cout_p * 2
        a_b = 2 * tm_ * tk_ * 2                          # double-buffered A tile
        y_b = 2 * tm_ * Cout_p * 4                       # double-buffered y tile
        return K_p_, w_resident_, a_b + w_b + y_b + (1 << 20)

    K_p, w_resident, ws = _plan(tm, tk)
    while ws > VMEM_BUDGET and (tm > 256 or tk > 128):
        if tm > 256:
            tm = max(256, _round_up(tm // 2, 8))
        else:
            tk = max(128, _round_up(tk // 2, 128))
        K_p, w_resident, ws = _plan(tm, tk)

    M_p = _round_up(M, tm)
    MI = M_p // tm
    KI = K_p // tk
    vmem1 = int(min(max(ws + (8 << 20), 32 << 20), 48 << 20))

    # ---- NHWC im2col prologue (slicing only), bf16 for the MXU -------------
    # TODO(synk): implicit-GEMM (shifted-window DMA) instead of materializing A
    # for KxK convs; this prologue is the largest remaining HBM cost.
    x_nhwc = jnp.transpose(x, (0, 2, 3, 1))
    if KH == 1 and KW == 1 and stride == 1 and padding == 0:
        A = x_nhwc.reshape(M, K).astype(jnp.bfloat16)    # 1x1 conv: pure reshape
    else:
        xp = jnp.pad(x_nhwc,
                     ((0, 0), (padding, padding), (padding, padding), (0, 0)))
        cols = []
        for kh in range(KH):
            for kw in range(KW):
                cols.append(xp[:, kh:kh + stride * OH:stride,
                               kw:kw + stride * OW:stride, :])
        A = jnp.concatenate(cols, axis=-1).reshape(M, K).astype(jnp.bfloat16)
    A = jnp.pad(A, ((0, M_p - M), (0, K_p - K)))

    # Weight flattened in the same (kh, kw, cin) order, lane-padded along Cout.
    Wm = weight.transpose(2, 3, 1, 0).reshape(K, Cout).astype(jnp.bfloat16)
    Wm = jnp.pad(Wm, ((0, K_p - K), (0, Cout_p - Cout)))

    if w_resident:
        w_spec = pl.BlockSpec((K_p, Cout_p), lambda i, k: (0, 0))   # loaded once
    else:
        w_spec = pl.BlockSpec((tk, Cout_p), lambda i, k: (k, 0))

    # (v5e: pipeline_mode=pl.Buffered(3) on the A spec could further hide its DMA.)
    y, psum, pm2 = pl.pallas_call(
        partial(conv_matmul_stats_kernel, tk=tk, w_resident=w_resident),
        out_shape=(
            jax.ShapeDtypeStruct((M_p, Cout_p), jnp.float32),
            jax.ShapeDtypeStruct((MI, 1, Cout_p), jnp.float32),
            jax.ShapeDtypeStruct((MI, 1, Cout_p), jnp.float32),
        ),
        grid=(MI, KI),
        in_specs=[
            pl.BlockSpec((tm, tk), lambda i, k: (i, k)),
            w_spec,
        ],
        out_specs=(
            pl.BlockSpec((tm, Cout_p), lambda i, k: (i, 0)),
            pl.BlockSpec((1, 1, Cout_p), lambda i, k: (i, 0, 0)),
            pl.BlockSpec((1, 1, Cout_p), lambda i, k: (i, 0, 0)),
        ),
        compiler_params=pltpu.CompilerParams(
            dimension_semantics=("parallel", "arbitrary"),
            vmem_limit_bytes=vmem1),
    )(A, Wm)

    # ---- tiny XLA step: Chan / parallel-variance merge of per-tile stats ----
    cnts = jnp.clip(M - jnp.arange(MI) * tm, 1, tm).astype(jnp.float32)[:, None]
    s_t = psum[:, 0, :]                                   # (MI, Cout_p)
    m2_t = pm2[:, 0, :]
    mu_pad = s_t / float(tm)            # tile mean including zero-padded rows
    mu_t = s_t / cnts                   # tile mean over valid rows only
    # m2_t was centered about mu_pad over all tm rows; remove the padded-zero
    # rows' contribution and re-center about mu_t.
    m2_valid = m2_t - (float(tm) - cnts) * mu_pad * mu_pad \
                    - cnts * (mu_t - mu_pad) ** 2
    m2_valid = jnp.maximum(m2_valid, 0.0)
    mean = jnp.sum(s_t, axis=0) / float(M)                # (Cout_p,)
    var = jnp.sum(m2_valid + cnts * (mu_t - mean[None, :]) ** 2, axis=0) / float(M)
    var = jnp.maximum(var, 0.0)                           # biased (train-mode BN)
    inv = jax.lax.rsqrt(var + eps)
    gamma_p = jnp.pad(gamma.astype(jnp.float32), (0, Cout_p - Cout))
    beta_p = jnp.pad(beta.astype(jnp.float32), (0, Cout_p - Cout))
    scale = (gamma_p * inv).reshape(1, Cout_p)
    shift = (beta_p - mean * gamma_p * inv).reshape(1, Cout_p)

    # ---- Pass 2: tiled BN-apply + ReLU over lane-dense blocks ---------------
    vmem2 = int(min(max(4 * tm * Cout_p * 4 + (8 << 20), 32 << 20), 48 << 20))
    out_p = pl.pallas_call(
        bn_apply_relu_kernel,
        out_shape=jax.ShapeDtypeStruct((M_p, Cout_p), jnp.float32),
        grid=(MI,),
        in_specs=[
            pl.BlockSpec((tm, Cout_p), lambda i: (i, 0)),
            pl.BlockSpec((1, Cout_p), lambda i: (0, 0)),
            pl.BlockSpec((1, Cout_p), lambda i: (0, 0)),
        ],
        out_specs=pl.BlockSpec((tm, Cout_p), lambda i: (i, 0)),
        compiler_params=pltpu.CompilerParams(
            dimension_semantics=("parallel",),
            vmem_limit_bytes=vmem2),
    )(y, scale, shift)

    out_nhwc = out_p[:M, :Cout].reshape(N, OH, OW, Cout)
    if out_layout == "NHWC":
        # Preferred when chaining BasicConv2d layers: skips the full-size
        # NHWC->NCHW transpose below.
        return out_nhwc
    # PyTorch module-boundary layout contract: NCHW.
    return out_nhwc.transpose(0, 3, 1, 2)


def _reference(x, weight, gamma, beta, *, stride, padding, eps=1e-3,
               conv_dtype=jnp.float32):
    # Pure-JAX reference of Conv2d(no bias) + train-mode BN + ReLU.
    y = jax.lax.conv_general_dilated(
        x.astype(conv_dtype), weight.astype(conv_dtype),
        window_strides=(stride, stride),
        padding=[(padding, padding), (padding, padding)],
        dimension_numbers=("NCHW", "OIHW", "NCHW"),
        preferred_element_type=jnp.float32)
    mean = jnp.mean(y, axis=(0, 2, 3), keepdims=True)
    var = jnp.mean((y - mean) ** 2, axis=(0, 2, 3), keepdims=True)
    yhat = (y - mean) * jax.lax.rsqrt(var + eps)
    yhat = yhat * gamma[None, :, None, None] + beta[None, :, None, None]
    return jnp.maximum(yhat, 0.0)


if __name__ == "__main__":
    # Shapes consistent with BasicConv2d(in_planes=4, out_planes=8,
    # kernel_size=3, stride=1, padding=1).
    N, Cin, H, W = 2, 4, 16, 16
    Cout, KH, KW = 8, 3, 3
    stride, padding, eps = 1, 1, 1e-3

    key = jax.random.PRNGKey(0)
    kx, kw = jax.random.split(key)
    x = jax.random.normal(kx, (N, Cin, H, W), dtype=jnp.float32)
    weight = jax.random.normal(kw, (Cout, Cin, KH, KW), dtype=jnp.float32) * 0.1
    gamma = jnp.ones((Cout,), dtype=jnp.float32)   # BatchNorm2d default init
    beta = jnp.zeros((Cout,), dtype=jnp.float32)

    def check(out, msg=""):
        ref_bf16 = _reference(x, weight, gamma, beta, stride=stride,
                              padding=padding, eps=eps, conv_dtype=jnp.bfloat16)
        ref_f32 = _reference(x, weight, gamma, beta, stride=stride,
                             padding=padding, eps=eps, conv_dtype=jnp.float32)
        assert out.shape == (N, Cout, H, W), msg
        assert np.allclose(np.asarray(out), np.asarray(ref_bf16),
                           rtol=2e-3, atol=2e-3), msg
        assert np.allclose(np.asarray(out), np.asarray(ref_f32),
                           rtol=5e-2, atol=5e-2), msg

    # Default tiles (auto-planned; MI >= 2 so both v7x cores would be used).
    out = jax.block_until_ready(
        basic_conv2d(x, weight, gamma, beta,
                     stride=stride, padding=padding, eps=eps))
    check(out, "default tiles")

    # Small tiles: multi-M-tile path (partial-stat Chan merge, pipelined apply).
    out_tiled = jax.block_until_ready(
        basic_conv2d(x, weight, gamma, beta,
                     stride=stride, padding=padding, eps=eps, tm=128, tk=128))
    check(out_tiled, "tm=128 tiles")

    # Non-divisible M tile: exercises the padded-row stats correction.
    out_ragged = jax.block_until_ready(
        basic_conv2d(x, weight, gamma, beta,
                     stride=stride, padding=padding, eps=eps, tm=200, tk=128))
    check(out_ragged, "tm=200 ragged tiles")

    # 1x1 conv fast path (no im2col gather).
    w1 = jax.random.normal(jax.random.PRNGKey(1), (Cout, Cin, 1, 1),
                           dtype=jnp.float32) * 0.1
    out_1x1 = jax.block_until_ready(
        basic_conv2d(x, w1, gamma, beta, stride=1, padding=0, eps=eps))
    ref_1x1 = _reference(x, w1, gamma, beta, stride=1, padding=0, eps=eps,
                         conv_dtype=jnp.bfloat16)
    assert out_1x1.shape == (N, Cout, H, W)
    assert np.allclose(np.asarray(out_1x1), np.asarray(ref_1x1),
                       rtol=2e-3, atol=2e-3)

    print("KERNEL_OK")
</pallas_src>

<mosaic_0001>
module attributes {stable_mosaic.version = 11 : i64} {
  func.func @conv_matmul_stats_kernel(%arg0: i32, %arg1: i32, %arg2: memref<256x128xbf16, #tpu.memory_space<vmem>>, %arg3: memref<128x128xbf16, #tpu.memory_space<vmem>>, %arg4: memref<256x128xf32, #tpu.memory_space<vmem>>, %arg5: memref<1x1x128xf32, #tpu.memory_space<vmem>>, %arg6: memref<1x1x128xf32, #tpu.memory_space<vmem>>) attributes {dimension_semantics = [#tpu.dimension_semantics<parallel>, #tpu.dimension_semantics<arbitrary>], iteration_bounds = array<i64: 2, 1>, scalar_prefetch = 0 : i64, scratch_operands = 0 : i64, tpu.core_type = #tpu.core_type<tc>, window_params = [{transform_indices = @transform_0, window_bounds = array<i64: 256, 128>}, {pipeline_mode = #tpu.pipeline_mode<synchronous>, transform_indices = @transform_1, window_bounds = array<i64: 128, 128>}, {transform_indices = @transform_2, window_bounds = array<i64: 256, 128>}, {transform_indices = @transform_3, window_bounds = array<i64: 1, 1, 128>}, {transform_indices = @transform_4, window_bounds = array<i64: 1, 1, 128>}]} {
    %c0_i32 = arith.constant 0 : i32
    %0 = arith.cmpi eq, %arg1, %c0_i32 : i32
    %1 = arith.extui %0 : i1 to i32
    %c0_i32_0 = arith.constant 0 : i32
    %2 = arith.cmpi ne, %1, %c0_i32_0 : i32
    scf.if %2 {
      %cst_9 = arith.constant 0.000000e+00 : f32
      %15 = vector.broadcast %cst_9 : f32 to vector<256x128xf32>
      %c0_10 = arith.constant 0 : index
      %c0_11 = arith.constant 0 : index
      %16 = vector.load %arg4[%c0_10, %c0_11] : memref<256x128xf32, #tpu.memory_space<vmem>>, vector<256x128xf32>
      tpu.vector_store %arg4[%c0_10, %c0_11], %15 {strides = array<i32>} : memref<256x128xf32, #tpu.memory_space<vmem>>, vector<256x128xf32>,
    } else {
    }
    %c128_i32 = arith.constant 128 : i32
    %3 = arith.muli %arg1, %c128_i32 : i32
    %4 = tpu.assume_multiple %3, 128 : i32
    %5 = arith.index_cast %4 : i32 to index
    %c0 = arith.constant 0 : index
    %6 = vector.load %arg3[%5, %c0] : memref<128x128xbf16, #tpu.memory_space<vmem>>, vector<128x128xbf16>
    %c0_1 = arith.constant 0 : index
    %c0_2 = arith.constant 0 : index
    %7 = vector.load %arg4[%c0_1, %c0_2] : memref<256x128xf32, #tpu.memory_space<vmem>>, vector<256x128xf32>
    %c0_3 = arith.constant 0 : index
    %c0_4 = arith.constant 0 : index
    %8 = vector.load %arg2[%c0_3, %c0_4] : memref<256x128xbf16, #tpu.memory_space<vmem>>, vector<256x128xbf16>
    %cst = arith.constant dense<0.000000e+00> : vector<256x128xf32>
    %9 = tpu.matmul %8, %6, %cst {dimension_numbers = #tpu.dot_dimension_numbers<[1], [0], [0], [1], [0, 0, 1, 1], [], []>} : vector<256x128xbf16>, vector<128x128xbf16>, vector<256x128xf32> -> vector<256x128xf32>
    %10 = arith.addf %7, %9 : vector<256x128xf32>
    %c0_5 = arith.constant 0 : index
    %c0_6 = arith.constant 0 : index
    %11 = vector.load %arg4[%c0_5, %c0_6] : memref<256x128xf32, #tpu.memory_space<vmem>>, vector<256x128xf32>
    tpu.vector_store %arg4[%c0_5, %c0_6], %10 {strides = array<i32>} : memref<256x128xf32, #tpu.memory_space<vmem>>, vector<256x128xf32>,
    %c0_i32_7 = arith.constant 0 : i32
    %12 = arith.cmpi eq, %arg1, %c0_i32_7 : i32
    %13 = arith.extui %12 : i1 to i32
    %c0_i32_8 = arith.constant 0 : i32
    %14 = arith.cmpi ne, %13, %c0_i32_8 : i32
    scf.if %14 {
      %c0_9 = arith.constant 0 : index
      %c0_10 = arith.constant 0 : index
      %15 = vector.load %arg4[%c0_9, %c0_10] : memref<256x128xf32, #tpu.memory_space<vmem>>, vector<256x128xf32>
      %cst_11 = arith.constant dense<0.000000e+00> : vector<128xf32>
      %16 = vector.multi_reduction <add>, %15, %cst_11 [0] : vector<256x128xf32> to vector<128xf32>
      %17 = vector.shape_cast %16 : vector<128xf32> to vector<1x128xf32>
      %cst_12 = arith.constant 3.906250e-03 : f32
      %18 = vector.broadcast %cst_12 : f32 to vector<1x128xf32>
      %19 = arith.mulf %17, %18 : vector<1x128xf32>
      %20 = vector.broadcast %19 : vector<1x128xf32> to vector<256x128xf32>
      %21 = arith.subf %15, %20 : vector<256x128xf32>
      %22 = arith.mulf %21, %21 : vector<256x128xf32>
      %cst_13 = arith.constant dense<0.000000e+00> : vector<128xf32>
      %23 = vector.multi_reduction <add>, %22, %cst_13 [0] : vector<256x128xf32> to vector<128xf32>
      %24 = vector.shape_cast %23 : vector<128xf32> to vector<1x128xf32>
      %25 = vector.shape_cast %17 : vector<1x128xf32> to vector<1x1x128xf32>
      %c0_14 = arith.constant 0 : index
      %c0_15 = arith.constant 0 : index
      %c0_16 = arith.constant 0 : index
      %26 = vector.load %arg5[%c0_14, %c0_15, %c0_16] : memref<1x1x128xf32, #tpu.memory_space<vmem>>, vector<1x1x128xf32>
      tpu.vector_store %arg5[%c0_14, %c0_15, %c0_16], %25 {strides = array<i32>} : memref<1x1x128xf32, #tpu.memory_space<vmem>>, vector<1x1x128xf32>,
      %27 = vector.shape_cast %24 : vector<1x128xf32> to vector<1x1x128xf32>
      %c0_17 = arith.constant 0 : index
      %c0_18 = arith.constant 0 : index
      %c0_19 = arith.constant 0 : index
      %28 = vector.load %arg6[%c0_17, %c0_18, %c0_19] : memref<1x1x128xf32, #tpu.memory_space<vmem>>, vector<1x1x128xf32>
      tpu.vector_store %arg6[%c0_17, %c0_18, %c0_19], %27 {strides = array<i32>} : memref<1x1x128xf32, #tpu.memory_space<vmem>>, vector<1x1x128xf32>,
    } else {
    }
    return
  }
  func.func @transform_0(%arg0: i32, %arg1: i32) -> (i32, i32) {
    %c0_i32 = arith.constant 0 : i32
    return %arg0, %arg1 : i32, i32
  }
  func.func @transform_1(%arg0: i32, %arg1: i32) -> (i32, i32) {
    %c0_i32 = arith.constant 0 : i32
    %c0_i32_0 = arith.constant 0 : i32
    %c0_i32_1 = arith.constant 0 : i32
    return %c0_i32, %c0_i32_0 : i32, i32
  }
  func.func @transform_2(%arg0: i32, %arg1: i32) -> (i32, i32) {
    %c0_i32 = arith.constant 0 : i32
    %c0_i32_0 = arith.constant 0 : i32
    return %arg0, %c0_i32 : i32, i32
  }
  func.func @transform_3(%arg0: i32, %arg1: i32) -> (i32, i32, i32) {
    %c0_i32 = arith.constant 0 : i32
    %c0_i32_0 = arith.constant 0 : i32
    %c0_i32_1 = arith.constant 0 : i32
    return %arg0, %c0_i32, %c0_i32_0 : i32, i32, i32
  }
  func.func @transform_4(%arg0: i32, %arg1: i32) -> (i32, i32, i32) {
    %c0_i32 = arith.constant 0 : i32
    %c0_i32_0 = arith.constant 0 : i32
    %c0_i32_1 = arith.constant 0 : i32
    return %arg0, %c0_i32, %c0_i32_0 : i32, i32, i32
  }
}

</mosaic_0001>

<bundles_post_ra>
// kernel: tpu_custom_call.1
= control target key start
LH: loop header
LB: loop body
LE: loop exit
PB: predicated region body
PF: predicated region fallthrough
CT: control target
= control target key end

     0   :  { %s1987_s0 = inlined_call_operand.hbm [shape: bf16[512,128], index: 0, kind: input, shape index: {}]   ;;  %s1988_s1 = inlined_call_operand.hbm [shape: bf16[128,128], index: 1, kind: input, shape index: {}]   ;;  %s1989_s2 = inlined_call_operand.hbm [shape: f32[512,128], index: 2, kind: output, shape index: {0}]   ;;  %s1990_s3 = inlined_call_operand.hbm [shape: f32[2,1,128], index: 3, kind: output, shape index: {1}]   ;;  %s1991_s4 = inlined_call_operand.hbm [shape: f32[2,1,128], index: 4, kind: output, shape index: {2}]  }
   0x1   :  { %1996 = sst [smem:[#allocation16_spill]] %s1988_s1 }
   0x2   :  { %10 = vsyncpa [#allocation3], 0 }
   0x3   :  { %12 = vsyncpa [#allocation3 + $0x1], 0 }
   0x4   :  { %13 = vsyncpa [#allocation6], 0 }
   0x5   :  { %14 = vsyncpa [#allocation4], 0 }
   0x6   :  { %16 = vsyncpa [#allocation4 + $0x1], 0 }
   0x7   :  { %17 = vsyncpa [#allocation9], 0 }
   0x8   :  { %19 = vsyncpa [#allocation9 + $0x1], 0  ;;  %s1549_s15 = smov 0   ;;  %s1551_s16 = smov 0  }
   0x9   :  { %s1553_s17 = smov 0   ;;  %s1555_s18 = smov 0  }
   0xa   :  { %s1557_s19 = smov 0   ;;  %s1559_s20 = smov 0  }
   0xb LB: > { %s1580_s21 = sadd.s32 4294967295, %s1517_s20   ;;  %s1992_s22 = sadd.s32 4294967294, %s1517_s20   ;;  %s1517_s20 = sphi %s1559_s20, %s25_s20   ;;  %s1513_s19 = sphi %s1557_s19, %s2012_s19   ;;  %s1509_s18 = sphi %s1555_s18, %s2011_s18   ;;  %s1505_s17 = sphi %s1553_s17, %s2010_s17   ;;  %s1501_s16 = sphi %s1551_s16, %s2009_s16   ;;  %s1497_s15 = sphi %s1549_s15, %s2008_s15  }
   0xc   : > { %p59_p0 = scmp.ne.s32.totalorder %s1501_s16, %s1497_s15  ;;  %p60_p1 = scmp.eq.s32.totalorder %s1580_s21, 0 }
   0xd   : > { %p104_p2 = scmp.eq.s32.totalorder %s1580_s21, 1  ;;  %p110_p3 = scmp.eq.s32.totalorder %s1992_s22, 1 }
   0xe   : > { %p1591_p4 = por %p60_p1, %p59_p0  ;;  %p1062_p5 = scmp.ge.s32.totalorder %s1517_s20, 1 }
   0xf   : > { %p1596_p6 = por %p110_p3, %p59_p0  ;;  %p169_p7 = scmp.lt.s32.totalorder %s1517_s20, 3 }
  0x10   : > { %s1999_s1 = sld [smem:[#allocation16_spill]]  ;;  %s1519_s29 = smov [#allocation5]  }
  0x11   : > { %p1604_p8 = pnand %p1062_p5, %p169_p7  ;;  %s182_s30 = sshll.u32 %s1519_s29, 4  ;;  %s183_s30 = int_to_ptr.vmem [resolvable:$true] %s182_s30 }
  0x12   : > { %p1064_p11 = scmp.ge.s32.totalorder %s1517_s20, 2  ;;  %s1993_s5 = smov 64  }
  0x13   : > { %p1235_p9 = pneg %p1604_p8  ;;  %s1994_s6 = smov 4  }
  0x14   : > { %s37_s7 = sadd.s32 1, %s1513_s19  ;;  %s46_s8 = sadd.s32 1, %s1505_s17 }
  0x15   : > { %p1236_p10 = pnand %p1235_p9, %p60_p1  ;;  %p39_p12 = scmp.ge.s32.totalorder %s37_s7, 2 }
  0x16   : > { %s180_s27 = sshll.u32 %s1999_s1, 4  ;;  %p53_p13 = scmp.ne.s32.totalorder %s1505_s17, %s1501_s16  ;;  %s181_s27 = int_to_ptr.hbm [resolvable:$true] %s180_s27 }
  0x17   : > { %1238 = dma.hbm_to_vmem [thread:$0]  (!%p1236_p10), %s181_s27, 1024, %s183_s30, [#allocation6], %s1993_s5, %s1993_s5, %s1994_s6  }
  0x18   : > { %p54_p0 = scmp.eq.s32.totalorder %s1517_s20, 0  ;;  %s2014_s7 = smov (%p39_p12, %s37_s7), 0 }
  0x19   : > { %2001 = sst [smem:[#allocation15_spill]] %s2014_s7  ;;  %p1629_p5 = por %p104_p2, %p53_p13 }
  0x1a   : > { %p1623_p3 = por %p54_p0, %p53_p13  ;;  %s41_s11 = ssub.s32 %s1513_s19, %s2014_s7 }
  0x1b   : > { %p1254_p7 = scmp.lt.s32.totalorder %s1517_s20, 2  ;;  %p44_p9 = scmp.eq.s32.totalorder %s41_s11, 0 }
  0x1c   : > { %s196_s12 = sand.u32 1, %s1505_s17   ;;  %s1173_s25 = sshll.u32 %s1513_s19, 7 }
  0x1d   : > { %s1065_s13 = sshll.u32 %s196_s12, 7  ;;  %s206_s29 = scalar_lea.hbm %s1987_s0, %s1173_s25 }
  0x1e   : > { %s1638_s14 = scalar_select %p44_p9, %s1505_s17, %s46_s8  }
  0x1f   : > { %s200_s30 = scalar_lea.vmem [#allocation2], %s1065_s13  ;;  %s207_s5 = sshll.u32 %s206_s29, 4  ;;  %s208_s5 = int_to_ptr.hbm [resolvable:$true] %s207_s5 }
  0x20   : > { %s209_s22 = sshll.u32 %s200_s30, 4  ;;  %p1240_p2 = pnand %p1254_p7, %p1623_p3  ;;  %s210_s22 = int_to_ptr.vmem [resolvable:$true] %s209_s22 }
  0x21   : > { %s197_s6 = scalar_lea.sflag [#allocation3], %s196_s12  ;;  %s2004_s1 = smov 4  }
  0x22   : > { %s2005_s7 = smov 64   ;;  %221 = sbr.rel (%p1604_p8) target bundleno = 403 (0x193), region = 28 }
  0x23   : > { %1242 = dma.hbm_to_vmem [thread:$0]  (!%p1240_p2), %s208_s5, 2048, %s210_s22, %s197_s6, %s2005_s7, %s2005_s7, %s2004_s1  }
  0x24   : > { %s1652_s8 = sand.u32 (!%p1604_p8), 1, %s1501_s16  }
  0x25   : > { %s1069_s11 = sshll.u32 (!%p1604_p8), %s1652_s8, 7  ;;  %s224_s13 = scalar_lea.sflag (!%p1604_p8), [#allocation3], %s1652_s8 }
  0x26   : > { %s1656_s25 = scalar_lea.vmem (!%p1604_p8), [#allocation2], %s1069_s11 }
  0x27   : > { %1480 = dma.done.wait (%p1591_p4), %s224_s13, 2048  }
  0x28   : > { %1482 = vsyncadd (%p1591_p4), %s224_s13, 4294965248 }
  0x29   : > { %1484 = dma.done.wait (%p60_p1), [#allocation6], 1024  }
  0x2a   : > { %1486 = vsyncadd (%p60_p1), [#allocation6], 4294966272  ;;  %v1181_v0 = vld [vmem:[#allocation5 + $0x38] sm:$0xff]  ;;  %v1180_v1 = vld [vmem:[#allocation5 + $0x30] sm:$0xff]  ;;  %s1071_s1 = sshll.u32 %s1652_s8, 8  ;;  %s1198_s23 = sshll.u32 %s1509_s18, 8 }
  0x2b   : > { %533 = vmatpush.bf16.msra.mxu0 %v1181_v0  ;;  %1199 = vmatpush.bf16.msra.mxu1 %v1181_v0  ;;  %v1179_v2 = vld [vmem:[#allocation5 + $0x28] sm:$0xff]  ;;  %v1178_v3 = vld [vmem:[#allocation5 + $0x20] sm:$0xff]  ;;  %v1177_v4 = vld [vmem:[#allocation5 + $0x18] sm:$0xff]  ;;  %s1687_s22 = scalar_lea.vmem [#allocation7], %s1071_s1  ;;  %s882_s6 = scalar_lea.hbm %s1989_s2, %s1198_s23 }
  0x2c   : > { %1200 = vmatpush.bf16.msra.mxu2 %v1181_v0  ;;  %1201 = vmatpush.bf16.msra.mxu3 %v1181_v0  ;;  %v1176_v5 = vld [vmem:[#allocation5 + $0x10] sm:$0xff]  ;;  %v1175_v6 = vld [vmem:[#allocation5 + $0x8] sm:$0xff]  ;;  %v1174_v7 = vld [vmem:[#allocation5] sm:$0xff]  ;;  %s883_s7 = sshll.u32 %s1687_s22, 4  ;;  %s885_s9 = sshll.u32 %s882_s6, 4  ;;  %s884_s7 = int_to_ptr.vmem [resolvable:$true] %s883_s7  ;;  %s886_s9 = int_to_ptr.hbm [resolvable:$true] %s885_s9 }
  0x2d   : > { %v1182_v8 = vld [vmem:[%s1656_s25] sm:$0xff]  ;;  %v1183_v12 = vld [vmem:[%s1656_s25 + $0x8] sm:$0xff]  ;;  %v1184_v16 = vld [vmem:[%s1656_s25 + $0x10] sm:$0xff]  ;;  %s863_s12 = scalar_lea.sflag [#allocation4], %s1652_s8  ;;  %s1385_s26 = sshra.s32 %s886_s9, 4  ;;  %s1386_s26 = int_to_ptr.hbm [resolvable:$true] %s1385_s26 }
  0x2e   : > { %v1186_v9 = vld [vmem:[%s1656_s25 + $0x20] sm:$0xff]  ;;  %v1187_v13 = vld [vmem:[%s1656_s25 + $0x28] sm:$0xff]  ;;  %v1188_v17 = vld [vmem:[%s1656_s25 + $0x30] sm:$0xff]  ;;  %s1387_s27 = scalar_lea.hbm %s1386_s26, 256  ;;  %s1391_s11 = scalar_lea.hbm %s1989_s2, 512 }
  0x2f   : > { %534 = vmatpush.bf16.msra.mxu0 %v1180_v1  ;;  %1202 = vmatpush.bf16.msra.mxu1 %v1180_v1  ;;  %v1190_v10 = vld [vmem:[%s1656_s25 + $0x40] sm:$0xff]  ;;  %v1191_v14 = vld [vmem:[%s1656_s25 + $0x48] sm:$0xff]  ;;  %v1192_v18 = vld [vmem:[%s1656_s25 + $0x50] sm:$0xff]  ;;  %p1388_p1 = scmp.ne.s32.totalorder %s1386_s26, %s1387_s27  ;;  %p1392_p10 = scmp.lt.s32.totalorder %s1386_s26, %s1989_s2 }
  0x30   : > { %1203 = vmatpush.bf16.msra.mxu2 %v1180_v1  ;;  %1204 = vmatpush.bf16.msra.mxu3 %v1180_v1  ;;  %v1194_v11 = vld [vmem:[%s1656_s25 + $0x60] sm:$0xff]  ;;  %v1195_v15 = vld [vmem:[%s1656_s25 + $0x68] sm:$0xff]  ;;  %v1196_v19 = vld [vmem:[%s1656_s25 + $0x70] sm:$0xff]  ;;  %p1393_p12 = scmp.lt.s32.totalorder %s1391_s11, %s1387_s27 }
  0x31   : > { %v1185_v20 = vld [vmem:[%s1656_s25 + $0x18] sm:$0xff]  ;;  %p1389_p4 = pnand %p1388_p1, %p1629_p5 }
  0x32   : > { %v1189_v21 = vld [vmem:[%s1656_s25 + $0x38] sm:$0xff]  ;;  %p1394_p13 = por %p1393_p12, %p1392_p10 }
  0x33   : > { %535 = vmatpush.bf16.msra.mxu0 %v1179_v2  ;;  %1205 = vmatpush.bf16.msra.mxu1 %v1179_v2  ;;  %v1193_v22 = vld [vmem:[%s1656_s25 + $0x58] sm:$0xff]  ;;  %p1390_p8 = pneg %p1389_p4 }
  0x34   : > { %1206 = vmatpush.bf16.msra.mxu2 %v1179_v2  ;;  %1207 = vmatpush.bf16.msra.mxu3 %v1179_v2  ;;  %v1197_v23 = vld [vmem:[%s1656_s25 + $0x78] sm:$0xff] }
  0x35   : > { %p1395_p0 = pnand %p1394_p13, %p1390_p8 }
  0x37   : > { %536 = vmatpush.bf16.msra.mxu0 %v1178_v3  ;;  %1208 = vmatpush.bf16.msra.mxu1 %v1178_v3 }
  0x38   : > { %1209 = vmatpush.bf16.msra.mxu2 %v1178_v3  ;;  %1210 = vmatpush.bf16.msra.mxu3 %v1178_v3 }
  0x3b   : > { %537 = vmatpush.bf16.msra.mxu0 %v1177_v4  ;;  %1211 = vmatpush.bf16.msra.mxu1 %v1177_v4 }
  0x3c   : > { %1212 = vmatpush.bf16.msra.mxu2 %v1177_v4  ;;  %1213 = vmatpush.bf16.msra.mxu3 %v1177_v4 }
  0x3f   : > { %538 = vmatpush.bf16.msra.mxu0 %v1176_v5  ;;  %1214 = vmatpush.bf16.msra.mxu1 %v1176_v5 }
  0x40   : > { %1215 = vmatpush.bf16.msra.mxu2 %v1176_v5  ;;  %1216 = vmatpush.bf16.msra.mxu3 %v1176_v5 }
  0x43   : > { %539 = vmatpush.bf16.msra.mxu0 %v1175_v6  ;;  %1217 = vmatpush.bf16.msra.mxu1 %v1175_v6 }
  0x44   : > { %1218 = vmatpush.bf16.msra.mxu2 %v1175_v6  ;;  %1219 = vmatpush.bf16.msra.mxu3 %v1175_v6 }
  0x47   : > { %540 = vmatpush.bf16.msra.mxu0 %v1174_v7  ;;  %1220 = vmatpush.bf16.msra.mxu1 %v1174_v7 }
  0x48   : > { %1221 = vmatpush.bf16.msra.mxu2 %v1174_v7  ;;  %1222 = vmatpush.bf16.msra.mxu3 %v1174_v7 }
  0x4a   : > { %541 = vmatmul.bf16.vlgmr.msra.gmra.mxu0 %v1182_v8  ;;  %561 = vmatmul.bf16.vlgmr.msra.gmra.mxu1 %v1186_v9 }
  0x4b   : > { %581 = vmatmul.bf16.vlgmr.msra.gmra.mxu2 %v1190_v10  ;;  %601 = vmatmul.bf16.vlgmr.msra.gmra.mxu3 %v1194_v11 }
  0x5a   : > { %546 = vmatmul.bf16.gmra.mxu0 %v1183_v12  ;;  %566 = vmatmul.bf16.gmra.mxu1 %v1187_v13 }
  0x5b   : > { %586 = vmatmul.bf16.gmra.mxu2 %v1191_v14  ;;  %606 = vmatmul.bf16.gmra.mxu3 %v1195_v15 }
  0x6a   : > { %551 = vmatmul.bf16.gmra.mxu0 %v1184_v16  ;;  %571 = vmatmul.bf16.gmra.mxu1 %v1188_v17 }
  0x6b   : > { %591 = vmatmul.bf16.gmra.mxu2 %v1192_v18  ;;  %611 = vmatmul.bf16.gmra.mxu3 %v1196_v19 }
  0x7a   : > { %556 = vmatmul.bf16.gmra.mxu0 %v1185_v20  ;;  %576 = vmatmul.bf16.gmra.mxu1 %v1189_v21 }
  0x7b   : > { %596 = vmatmul.bf16.gmra.mxu2 %v1193_v22  ;;  %616 = vmatmul.bf16.gmra.mxu3 %v1197_v23 }
  0xc7   : > { %v1683_v24 = vpop.f32.mrf.mxu0  ;;  %v1685_v25 = vpop.f32.mrf.mxu1 }
  0xc8   : > { %654 = vst [vmem:[%s1687_s22] sm:$0xff] %v1683_v24 }
  0xc9   : > { %662 = vst [vmem:[%s1687_s22 + $0x40] sm:$0xff] %v1685_v25 }
  0xce   : > { %v1693_v26 = vpop.f32.mrf.mxu2  ;;  %v1699_v29 = vpop.f32.mrf.mxu3 }
  0xcf   : > { %v1695_v27 = vpop.f32.mrf.mxu0  ;;  %v1697_v28 = vpop.f32.mrf.mxu1  ;;  %670 = vst [vmem:[%s1687_s22 + $0x80] sm:$0xff] %v1693_v26 }
  0xd0   : > { %655 = vst [vmem:[%s1687_s22 + $0x8] sm:$0xff] %v1695_v27  ;;  %v721_v46 = vadd.f32 %v1695_v27, %v1683_v24 }
  0xd1   : > { %663 = vst [vmem:[%s1687_s22 + $0x48] sm:$0xff] %v1697_v28 }
  0xd2   : > { %678 = vst [vmem:[%s1687_s22 + $0xc0] sm:$0xff] %v1699_v29 }
  0xd6   : > { %v1709_v30 = vpop.f32.mrf.mxu2  ;;  %v1715_v33 = vpop.f32.mrf.mxu3 }
  0xd7   : > { %v1711_v31 = vpop.f32.mrf.mxu0  ;;  %v1713_v32 = vpop.f32.mrf.mxu1  ;;  %671 = vst [vmem:[%s1687_s22 + $0x88] sm:$0xff] %v1709_v30 }
  0xd8   : > { %656 = vst [vmem:[%s1687_s22 + $0x10] sm:$0xff] %v1711_v31  ;;  %v722_v50 = vadd.f32 %v721_v46, %v1711_v31 }
  0xd9   : > { %664 = vst [vmem:[%s1687_s22 + $0x50] sm:$0xff] %v1713_v32 }
  0xda   : > { %679 = vst [vmem:[%s1687_s22 + $0xc8] sm:$0xff] %v1715_v33 }
  0xde   : > { %v1725_v34 = vpop.f32.mrf.mxu2  ;;  %v1731_v37 = vpop.f32.mrf.mxu3 }
  0xdf   : > { %v1727_v35 = vpop.f32.mrf.mxu0  ;;  %v1729_v36 = vpop.f32.mrf.mxu1  ;;  %672 = vst [vmem:[%s1687_s22 + $0x90] sm:$0xff] %v1725_v34 }
  0xe0   : > { %657 = vst [vmem:[%s1687_s22 + $0x18] sm:$0xff] %v1727_v35  ;;  %v723_v52 = vadd.f32 %v722_v50, %v1727_v35 }
  0xe1   : > { %665 = vst [vmem:[%s1687_s22 + $0x58] sm:$0xff] %v1729_v36 }
  0xe2   : > { %680 = vst [vmem:[%s1687_s22 + $0xd0] sm:$0xff] %v1731_v37 }
  0xe6   : > { %v1739_v38 = vpop.f32.mrf.mxu2  ;;  %v1745_v41 = vpop.f32.mrf.mxu3 }
  0xe7   : > { %v1741_v39 = vpop.f32.mrf.mxu0  ;;  %v1743_v40 = vpop.f32.mrf.mxu1  ;;  %673 = vst [vmem:[%s1687_s22 + $0x98] sm:$0xff] %v1739_v38 }
  0xe8   : > { %658 = vst [vmem:[%s1687_s22 + $0x20] sm:$0xff] %v1741_v39  ;;  %v724_v53 = vadd.f32 %v723_v52, %v1741_v39 }
  0xe9   : > { %666 = vst [vmem:[%s1687_s22 + $0x60] sm:$0xff] %v1743_v40 }
  0xea   : > { %681 = vst [vmem:[%s1687_s22 + $0xd8] sm:$0xff] %v1745_v41 }
  0xee   : > { %v1757_v42 = vpop.f32.mrf.mxu2  ;;  %v1763_v45 = vpop.f32.mrf.mxu3 }
  0xef   : > { %v1759_v43 = vpop.f32.mrf.mxu0  ;;  %v1761_v44 = vpop.f32.mrf.mxu1  ;;  %674 = vst [vmem:[%s1687_s22 + $0xa0] sm:$0xff] %v1757_v42 }
  0xf0   : > { %659 = vst [vmem:[%s1687_s22 + $0x28] sm:$0xff] %v1759_v43  ;;  %v725_v54 = vadd.f32 %v724_v53, %v1759_v43 }
  0xf1   : > { %667 = vst [vmem:[%s1687_s22 + $0x68] sm:$0xff] %v1761_v44 }
  0xf2   : > { %682 = vst [vmem:[%s1687_s22 + $0xe0] sm:$0xff] %v1763_v45 }
  0xf6   : > { %v1773_v47 = vpop.f32.mrf.mxu2  ;;  %v1782_v51 = vpop.f32.mrf.mxu3 }
  0xf7   : > { %v1777_v48 = vpop.f32.mrf.mxu0  ;;  %v1779_v49 = vpop.f32.mrf.mxu1  ;;  %675 = vst [vmem:[%s1687_s22 + $0xa8] sm:$0xff] %v1773_v47 }
  0xf8   : > { %660 = vst [vmem:[%s1687_s22 + $0x30] sm:$0xff] %v1777_v48  ;;  %v726_v58 = vadd.f32 %v725_v54, %v1777_v48 }
  0xf9   : > { %668 = vst [vmem:[%s1687_s22 + $0x70] sm:$0xff] %v1779_v49 }
  0xfa   : > { %683 = vst [vmem:[%s1687_s22 + $0xe8] sm:$0xff] %v1782_v51 }
  0xfe   : > { %v1795_v55 = vpop.f32.mrf.mxu2  ;;  %v1803_v59 = vpop.f32.mrf.mxu3 }
  0xff   : > { %v1797_v56 = vpop.f32.mrf.mxu0  ;;  %v1799_v57 = vpop.f32.mrf.mxu1  ;;  %676 = vst [vmem:[%s1687_s22 + $0xb0] sm:$0xff] %v1795_v55 }
 0x100   : > { %661 = vst [vmem:[%s1687_s22 + $0x38] sm:$0xff] %v1797_v56  ;;  %v727_v60 = vadd.f32 %v726_v58, %v1797_v56 }
 0x101   : > { %669 = vst [vmem:[%s1687_s22 + $0x78] sm:$0xff] %v1799_v57 }
 0x102   : > { %v728_v61 = vadd.f32 %v727_v60, %v1685_v25  ;;  %684 = vst [vmem:[%s1687_s22 + $0xf0] sm:$0xff] %v1803_v59 }
 0x104   : > { %v729_v62 = vadd.f32 %v728_v61, %v1697_v28 }
 0x106   : > { %v1820_v63 = vpop.f32.mrf.mxu2  ;;  %v730_v0 = vadd.f32 %v729_v62, %v1713_v32  ;;  %v1823_v1 = vpop.f32.mrf.mxu3 }
 0x107   : > { %677 = vst [vmem:[%s1687_s22 + $0xb8] sm:$0xff] %v1820_v63 }
 0x108   : > { %v731_v2 = vadd.f32 %v730_v0, %v1729_v36  ;;  %685 = vst [vmem:[%s1687_s22 + $0xf8] sm:$0xff] %v1823_v1 }
 0x10a   : > { %v732_v3 = vadd.f32 %v731_v2, %v1743_v40 }
 0x10b   : > { %1398 = shalt.err (!%p1395_p0)
}
 0x10c   : > { %s1522_s1 = smov 128   ;;  %s1523_s22 = smov 8   ;;  %v733_v4 = vadd.f32 %v732_v3, %v1761_v44 }
 0x10d   : > { %1229 = dma.vmem_to_hbm [thread:$0]  (%p1629_p5), %s884_s7, 4096, %s886_s9, %s863_s12, %s1522_s1, %s1522_s1, %s1523_s22  }
 0x10e   : > { %v734_v5 = vadd.f32 %v733_v4, %v1779_v49  ;;  %s897_s5 = scalar_lea.hbm %s1990_s3, %s1509_s18  ;;  %s867_s6 = sand.u32 1, %s1580_s21  }
 0x10f   : > { %s259_s7 = scalar_lea.vmem [#allocation8], %s1652_s8  ;;  %s901_s12 = sshll.u32 %s897_s5, 4  ;;  %s902_s12 = int_to_ptr.hbm [resolvable:$true] %s901_s12 }
 0x110   : > { %v735_v6 = vadd.f32 %v734_v5, %v1799_v57  ;;  %s899_s9 = sshll.u32 %s259_s7, 4  ;;  %s1867_s26 = scalar_lea.sflag [#allocation9], %s867_s6  ;;  %s900_s9 = int_to_ptr.vmem [resolvable:$true] %s899_s9 }
 0x111   : > { %s1413_s27 = sshra.s32 %s902_s12, 4  ;;  %s1419_s21 = scalar_lea.hbm %s1990_s3, 2  ;;  %s1414_s27 = int_to_ptr.hbm [resolvable:$true] %s1413_s27 }
 0x112   : > { %v736_v7 = vadd.f32 %v735_v6, %v1693_v26  ;;  %s1415_s29 = scalar_lea.hbm %s1414_s27, 1  ;;  %p1420_p2 = scmp.lt.s32.totalorder %s1414_s27, %s1990_s3 }
 0x113   : > { %p1416_p3 = scmp.ne.s32.totalorder %s1414_s27, %s1415_s29  ;;  %p1421_p1 = scmp.lt.s32.totalorder %s1419_s21, %s1415_s29 }
 0x114   : > { %v737_v8 = vadd.f32 %v736_v7, %v1709_v30 }
 0x115   : > { %p1417_p7 = pnand %p1416_p3, %p1629_p5  ;;  %p1422_p4 = por %p1421_p1, %p1420_p2 }
 0x116   : > { %v738_v9 = vadd.f32 %v737_v8, %v1725_v34 }
 0x117   : > { %p1418_p9 = pneg %p1417_p7 }
 0x118   : > { %v739_v10 = vadd.f32 %v738_v9, %v1739_v38 }
 0x119   : > { %p1423_p8 = pnand %p1422_p4, %p1418_p9 }
 0x11a   : > { %v740_v11 = vadd.f32 %v739_v10, %v1757_v42 }
 0x11c   : > { %v741_v12 = vadd.f32 %v740_v11, %v1773_v47 }
 0x11e   : > { %v742_v13 = vadd.f32 %v741_v12, %v1795_v55 }
 0x120   : > { %v743_v14 = vadd.f32 %v742_v13, %v1820_v63 }
 0x122   : > { %v744_v15 = vadd.f32 %v743_v14, %v1699_v29 }
 0x124   : > { %v745_v16 = vadd.f32 %v744_v15, %v1715_v33 }
 0x126   : > { %v746_v17 = vadd.f32 %v745_v16, %v1731_v37 }
 0x128   : > { %v747_v18 = vadd.f32 %v746_v17, %v1745_v41 }
 0x12a   : > { %v748_v19 = vadd.f32 %v747_v18, %v1763_v45 }
 0x12c   : > { %v749_v20 = vadd.f32 %v748_v19, %v1782_v51 }
 0x12e   : > { %v750_v21 = vadd.f32 %v749_v20, %v1803_v59 }
 0x130   : > { %v751_v22 = vadd.f32 %v750_v21, %v1823_v1 }
 0x132   : > { %v752_v23 = vrot.slane %v751_v22, 4 }
 0x134   : > { %v753_v46 = vadd.f32 %v752_v23, %v751_v22 }
 0x136   : > { %v754_v50 = vrot.slane %v753_v46, 2 }
 0x138   : > { %v755_v52 = vadd.f32 %v754_v50, %v753_v46 }
 0x13a   : > { %v756_v53 = vrot.slane %v755_v52, 1 }
 0x13c   : > { %v757_v54 = vadd.f32 %v756_v53, %v755_v52 }
 0x13e   : > { %860 = vst [vmem:[%s259_s7] sm:$0x1] %v757_v54 }
 0x13f   : > { %1426 = shalt.err (!%p1423_p8)
}
 0x140   : > { %1230 = dma.vmem_to_hbm [thread:$0]  (%p1629_p5), %s900_s9, 16, %s902_s12, %s1867_s26   ;;  %v1880_v58 = vmul.f32 0.00390625, %v757_v54 }
 0x141   : > { %s910_s23 = scalar_lea.hbm %s1991_s4, %s1509_s18  ;;  %s265_s28 = scalar_lea.vmem [#allocation10], %s1652_s8 }
 0x142   : > { %v759_v60 = vsub.f32 %v1683_v24, %v1880_v58  ;;  %v760_v61 = vsub.f32 %v1695_v27, %v1880_v58  ;;  %v761_v62 = vsub.f32 %v1711_v31, %v1880_v58  ;;  %v762_v3 = vsub.f32 %v1727_v35, %v1880_v58  ;;  %s912_s5 = sshll.u32 %s265_s28, 4  ;;  %s914_s6 = sshll.u32 %s910_s23, 4  ;;  %s913_s5 = int_to_ptr.vmem [resolvable:$true] %s912_s5  ;;  %s915_s6 = int_to_ptr.hbm [resolvable:$true] %s914_s6 }
 0x143   : > { %v763_v4 = vsub.f32 %v1741_v39, %v1880_v58  ;;  %v764_v7 = vsub.f32 %v1759_v43, %v1880_v58  ;;  %v765_v27 = vsub.f32 %v1777_v48, %v1880_v58  ;;  %v766_v10 = vsub.f32 %v1797_v56, %v1880_v58  ;;  %s1441_s7 = sshra.s32 %s915_s6, 4  ;;  %s1447_s18 = scalar_lea.hbm %s1991_s4, 2  ;;  %s1442_s7 = int_to_ptr.hbm [resolvable:$true] %s1441_s7 }
 0x144   : > { %v791_v0 = vmul.f32 %v759_v60, %v759_v60  ;;  %v792_v2 = vmul.f32 %v760_v61, %v760_v61  ;;  %v793_v5 = vmul.f32 %v761_v62, %v761_v62  ;;  %v794_v24 = vmul.f32 %v762_v3, %v762_v3  ;;  %s1443_s9 = scalar_lea.hbm %s1442_s7, 1  ;;  %p1448_p0 = scmp.lt.s32.totalorder %s1442_s7, %s1991_s4 }
 0x145   : > { %v795_v9 = vmul.f32 %v763_v4, %v763_v4  ;;  %v796_v11 = vmul.f32 %v764_v7, %v764_v7  ;;  %v767_v39 = vsub.f32 %v1685_v25, %v1880_v58  ;;  %v797_v12 = vmul.f32 %v765_v27, %v765_v27  ;;  %p1444_p10 = scmp.ne.s32.totalorder %s1442_s7, %s1443_s9  ;;  %p1449_p3 = scmp.lt.s32.totalorder %s1447_s18, %s1443_s9 }
 0x146   : > { %v823_v6 = vadd.f32 %v792_v2, %v791_v0  ;;  %v768_v43 = vsub.f32 %v1697_v28, %v1880_v58  ;;  %v798_v14 = vmul.f32 %v766_v10, %v766_v10  ;;  %v769_v48 = vsub.f32 %v1713_v32, %v1880_v58 }
 0x147   : > { %v799_v16 = vmul.f32 %v767_v39, %v767_v39  ;;  %v770_v56 = vsub.f32 %v1729_v36, %v1880_v58  ;;  %v771_v25 = vsub.f32 %v1743_v40, %v1880_v58  ;;  %v772_v28 = vsub.f32 %v1761_v44, %v1880_v58  ;;  %p1445_p12 = pnand %p1444_p10, %p1629_p5  ;;  %p1450_p7 = por %p1449_p3, %p1448_p0 }
 0x148   : > { %v824_v8 = vadd.f32 %v823_v6, %v793_v5  ;;  %v800_v18 = vmul.f32 %v768_v43, %v768_v43  ;;  %v801_v20 = vmul.f32 %v769_v48, %v769_v48  ;;  %v773_v32 = vsub.f32 %v1779_v49, %v1880_v58 }
 0x149   : > { %v802_v22 = vmul.f32 %v770_v56, %v770_v56  ;;  %v803_v46 = vmul.f32 %v771_v25, %v771_v25  ;;  %v774_v36 = vsub.f32 %v1799_v57, %v1880_v58  ;;  %v804_v52 = vmul.f32 %v772_v28, %v772_v28  ;;  %p1446_p13 = pneg %p1445_p12 }
 0x14a   : > { %v825_v31 = vadd.f32 %v824_v8, %v794_v24  ;;  %v775_v40 = vsub.f32 %v1693_v26, %v1880_v58  ;;  %v805_v54 = vmul.f32 %v773_v32, %v773_v32  ;;  %v776_v44 = vsub.f32 %v1709_v30, %v1880_v58 }
 0x14b   : > { %v806_v61 = vmul.f32 %v774_v36, %v774_v36  ;;  %v777_v49 = vsub.f32 %v1725_v34, %v1880_v58  ;;  %v778_v57 = vsub.f32 %v1739_v38, %v1880_v58  ;;  %v779_v26 = vsub.f32 %v1757_v42, %v1880_v58  ;;  %p1451_p9 = pnand %p1450_p7, %p1446_p13 }
 0x14c   : > { %v826_v35 = vadd.f32 %v825_v31, %v795_v9  ;;  %v807_v0 = vmul.f32 %v775_v40, %v775_v40  ;;  %v808_v3 = vmul.f32 %v776_v44, %v776_v44  ;;  %v780_v30 = vsub.f32 %v1773_v47, %v1880_v58 }
 0x14d   : > { %v809_v5 = vmul.f32 %v777_v49, %v777_v49  ;;  %v810_v7 = vmul.f32 %v778_v57, %v778_v57  ;;  %v781_v34 = vsub.f32 %v1795_v55, %v1880_v58  ;;  %v811_v8 = vmul.f32 %v779_v26, %v779_v26 }
 0x14e   : > { %v827_v13 = vadd.f32 %v826_v35, %v796_v11  ;;  %v782_v38 = vsub.f32 %v1820_v63, %v1880_v58  ;;  %v812_v9 = vmul.f32 %v780_v30, %v780_v30  ;;  %v783_v42 = vsub.f32 %v1699_v29, %v1880_v58 }
 0x14f   : > { %v813_v10 = vmul.f32 %v781_v34, %v781_v34  ;;  %v784_v47 = vsub.f32 %v1715_v33, %v1880_v58  ;;  %v785_v55 = vsub.f32 %v1731_v37, %v1880_v58  ;;  %v786_v63 = vsub.f32 %v1745_v41, %v1880_v58 }
 0x150   : > { %v828_v15 = vadd.f32 %v827_v13, %v797_v12  ;;  %v814_v35 = vmul.f32 %v782_v38, %v782_v38  ;;  %v815_v12 = vmul.f32 %v783_v42, %v783_v42  ;;  %v787_v29 = vsub.f32 %v1763_v45, %v1880_v58 }
 0x151   : > { %v816_v43 = vmul.f32 %v784_v47, %v784_v47  ;;  %v788_v33 = vsub.f32 %v1782_v51, %v1880_v58  ;;  %v789_v37 = vsub.f32 %v1803_v59, %v1880_v58  ;;  %v790_v41 = vsub.f32 %v1823_v1, %v1880_v58 }
 0x152   : > { %v829_v17 = vadd.f32 %v828_v15, %v798_v14  ;;  %v817_v15 = vmul.f32 %v785_v55, %v785_v55  ;;  %v819_v56 = vmul.f32 %v787_v29, %v787_v29 }
 0x153   : > { %v821_v45 = vmul.f32 %v789_v37, %v789_v37 }
 0x154   : > { %v830_v19 = vadd.f32 %v829_v17, %v799_v16  ;;  %v818_v16 = vmul.f32 %v786_v63, %v786_v63 }
 0x156   : > { %v831_v21 = vadd.f32 %v830_v19, %v800_v18  ;;  %v820_v19 = vmul.f32 %v788_v33, %v788_v33 }
 0x158   : > { %v832_v23 = vadd.f32 %v831_v21, %v801_v20  ;;  %v822_v21 = vmul.f32 %v790_v41, %v790_v41 }
 0x15a   : > { %v833_v50 = vadd.f32 %v832_v23, %v802_v22 }
 0x15c   : > { %v834_v53 = vadd.f32 %v833_v50, %v803_v46 }
 0x15e   : > { %v835_v60 = vadd.f32 %v834_v53, %v804_v52 }
 0x160   : > { %v836_v62 = vadd.f32 %v835_v60, %v805_v54 }
 0x162   : > { %v837_v2 = vadd.f32 %v836_v62, %v806_v61 }
 0x164   : > { %v838_v4 = vadd.f32 %v837_v2, %v807_v0 }
 0x166   : > { %v839_v6 = vadd.f32 %v838_v4, %v808_v3 }
 0x168   : > { %v840_v24 = vadd.f32 %v839_v6, %v809_v5 }
 0x16a   : > { %v841_v27 = vadd.f32 %v840_v24, %v810_v7 }
 0x16c   : > { %v842_v31 = vadd.f32 %v841_v27, %v811_v8 }
 0x16e   : > { %v843_v11 = vadd.f32 %v842_v31, %v812_v9 }
 0x170   : > { %v844_v39 = vadd.f32 %v843_v11, %v813_v10 }
 0x172   : > { %v845_v13 = vadd.f32 %v844_v39, %v814_v35 }
 0x174   : > { %v846_v14 = vadd.f32 %v845_v13, %v815_v12 }
 0x176   : > { %v847_v48 = vadd.f32 %v846_v14, %v816_v43 }
 0x178   : > { %v848_v17 = vadd.f32 %v847_v48, %v817_v15 }
 0x17a   : > { %v849_v18 = vadd.f32 %v848_v17, %v818_v16 }
 0x17c   : > { %v850_v25 = vadd.f32 %v849_v18, %v819_v56 }
 0x17e   : > { %v851_v20 = vadd.f32 %v850_v25, %v820_v19 }
 0x180   : > { %v852_v28 = vadd.f32 %v851_v20, %v821_v45 }
 0x182   : > { %v853_v22 = vadd.f32 %v852_v28, %v822_v21 }
 0x184   : > { %v854_v51 = vrot.slane %v853_v22, 4 }
 0x186   : > { %v855_v23 = vadd.f32 %v854_v51, %v853_v22 }
 0x188   : > { %v856_v32 = vrot.slane %v855_v23, 2 }
 0x18a   : > { %v857_v59 = vadd.f32 %v856_v32, %v855_v23 }
 0x18c   : > { %v858_v1 = vrot.slane %v857_v59, 1 }
 0x18e   : > { %v859_v58 = vadd.f32 %v858_v1, %v857_v59 }
 0x190   : > { %861 = vst [vmem:[%s265_s28] sm:$0x1] %v859_v58 }
 0x191   : > { %1454 = shalt.err (!%p1451_p9)
}
 0x192   : > { %1231 = dma.vmem_to_hbm [thread:$0]  (%p1629_p5), %s913_s5, 16, %s915_s6, %s1867_s26  }
 0x193 PF: > { %s926_s30 = sand.u32 1, %s1497_s15   ;;  %p1244_p2 = pnand %p1064_p11, %p1596_p6 }
 0x194   : > { %s927_s11 = scalar_lea.sflag [#allocation4], %s926_s30 }
 0x195   : > { %p1245_p1 = pneg %p1244_p2 }
 0x197   : > { %1488 = dma.done.wait (%p1245_p1), %s927_s11, 4096  }
 0x198   : > { %1490 = vsyncadd (%p1245_p1), %s927_s11, 4294963200  ;;  %s2006_s21 = sadd.s32 4294967294, %s1517_s20  }
 0x199   : > { %s936_s13 = sand.u32 1, %s2006_s21  }
 0x19a   : > { %s937_s25 = scalar_lea.sflag [#allocation9], %s936_s13 }
 0x19b   : > { %1492 = dma.done.wait (%p1245_p1), %s937_s25, 32  }
 0x19c   : > { %1494 = vsyncadd (%p1245_p1), %s937_s25, 4294967264  ;;  %s25_s20 = sadd.s32 1, %s1517_s20   ;;  %s2007_s24 = sld [smem:[#allocation15_spill]] }
 0x19d   : > { %p22_p5 = scmp.ge.s32.totalorder %s25_s20, 4   ;;  %s2008_s15 = smov %s1501_s16 }
 0x19e   : > { %s2009_s16 = smov %s1505_s17  ;;  %s2010_s17 = smov %s1638_s14 }
 0x19f   : > { %s2011_s18 = smov %s1513_s19  ;;  %24 = sbr.rel (!%p22_p5) target bundleno = 11 (0xb), region = 118 }
 0x1a2   : > { %s2012_s19 = smov %s2007_s24 }
 0x1a4   :  { %951 = vsyncpa [#allocation3], 1 }
 0x1a5   :  { %953 = vsyncpa [#allocation3 + $0x1], 1 }
 0x1a6   :  { %954 = vsyncpa [#allocation6], 1 }
 0x1a7   :  { %955 = vsyncpa [#allocation4], 1 }
 0x1a8   :  { %957 = vsyncpa [#allocation4 + $0x1], 1 }
 0x1a9   :  { %958 = vsyncpa [#allocation9], 1 }
 0x1aa   :  { %960 = vsyncpa [#allocation9 + $0x1], 1 }

</bundles_post_ra>
